<compile_context>
chip_gen: v6e
topology: v6e:2x2x1
jax: 0.10.0
libtpu: 0.0.40
codegen_flags: <defaults>
</compile_context>

<pallas_src>
import jax
import jax.numpy as jnp
from jax.experimental import pallas as pl
from jax.experimental.pallas import tpu as pltpu


def _round_up(n, m):
    return ((n + m - 1) // m) * m


def _mlp_kernel(w1_ref, b1_ref, w2_ref, b2_ref, w3_ref, b3_ref, x_ref, o_ref):
    # x_ref: [4, TB] (batch in lanes), o_ref: [3, TB]
    # w*_ref / b*_ref: tiny weights & biases in SMEM (scalar reads).
    x_rows = [x_ref[k:k + 1, :] for k in range(4)]          # each [1, TB]

    def dense(rows, w_ref, b_ref, n_in, n_out):
        # out[j, :] = sum_k W[k, j] * rows[k] + b[j], fully unrolled on the VPU.
        out = []
        for j in range(n_out):
            acc = rows[0] * w_ref[0, j] + b_ref[j]          # bias as acc init
            for k in range(1, n_in):
                acc = acc + rows[k] * w_ref[k, j]
            out.append(acc)
        return out

    h1 = [jnp.maximum(r, 0.0) for r in dense(x_rows, w1_ref, b1_ref, 4, 5)]
    h2 = [jnp.maximum(r, 0.0) for r in dense(h1, w2_ref, b2_ref, 5, 5)]
    z0, z1, z2 = dense(h2, w3_ref, b3_ref, 5, 3)            # logits, [1, TB] each

    # Softmax over the 3 class rows: pairwise max/adds (VPU), exp + approx
    # reciprocal (EUP) -- no XLU reduction, no vector divide.
    m = jnp.maximum(jnp.maximum(z0, z1), z2)
    e0 = jnp.exp(z0 - m)
    e1 = jnp.exp(z1 - m)
    e2 = jnp.exp(z2 - m)
    inv = pl.reciprocal(e0 + e1 + e2, approx=True)
    o_ref[0:1, :] = (e0 * inv).astype(o_ref.dtype)
    o_ref[1:2, :] = (e1 * inv).astype(o_ref.dtype)
    o_ref[2:3, :] = (e2 * inv).astype(o_ref.dtype)


def net_forward(x, params, *, tb=None):
    """x: [B, 4] float32 -> softmax probs [B, 3] float32."""
    w1, b1, w2, b2, w3, b3 = params
    B = x.shape[0]

    # Lane tile along the batch: multiple of 128; modest default keeps well
    # under the v7x 64 MiB VMEM / 32 MiB scoped limit while amortizing the
    # ~0.35us per-grid-step overhead.
    if tb is None:
        tb = 512 if B >= 512 else _round_up(B, 128)
    tb = max(128, _round_up(tb, 128))
    b_pad = _round_up(B, tb)

    # Transpose/pad in the wrapper so the kernel sees a lane-dense [4, B_pad].
    x_t = jnp.pad(x.astype(jnp.float32), ((0, b_pad - B), (0, 0))).T

    smem = pl.BlockSpec(memory_space=pltpu.MemorySpace.SMEM)
    grid = (b_pad // tb,)

    out_t = pl.pallas_call(
        _mlp_kernel,
        out_shape=jax.ShapeDtypeStruct((3, b_pad), jnp.float32),
        grid=grid,
        in_specs=[smem, smem, smem, smem, smem, smem,
                  pl.BlockSpec((4, tb), lambda i: (0, i))],
        out_specs=pl.BlockSpec((3, tb), lambda i: (0, i)),
        compiler_params=pltpu.CompilerParams(
            dimension_semantics=("parallel",)),
    )(w1, b1.reshape(-1), w2, b2.reshape(-1), w3, b3.reshape(-1), x_t)

    return out_t.T[:B]


def init_params(key):
    # Mimic PyTorch nn.Linear default init: U(-1/sqrt(fan_in), 1/sqrt(fan_in)).
    ks = jax.random.split(key, 6)

    def lin(kw, kb, fan_in, fan_out):
        bound = 1.0 / jnp.sqrt(fan_in)
        w = jax.random.uniform(kw, (fan_in, fan_out), jnp.float32, -bound, bound)
        b = jax.random.uniform(kb, (1, fan_out), jnp.float32, -bound, bound)
        return w, b

    w1, b1 = lin(ks[0], ks[1], 4, 5)
    w2, b2 = lin(ks[2], ks[3], 5, 5)
    w3, b3 = lin(ks[4], ks[5], 5, 3)
    return (w1, b1, w2, b2, w3, b3)


if __name__ == "__main__":
    key = jax.random.PRNGKey(0)
    k_x, k_p = jax.random.split(key)

    B = 300  # not a multiple of 128: exercises padding + a 3-step batch grid
    x = jax.random.normal(k_x, (B, 4), jnp.float32)
    params = init_params(k_p)

    out = net_forward(x, params, tb=128)
    out = jax.block_until_ready(out)

    # Pure-JAX reference (same math as the PyTorch module).
    w1, b1, w2, b2, w3, b3 = params
    h1 = jnp.maximum(x @ w1 + b1, 0.0)
    h2 = jnp.maximum(h1 @ w2 + b2, 0.0)
    ref = jax.nn.softmax(h2 @ w3 + b3, axis=-1)

    assert out.shape == (B, 3)
    # approx reciprocal -> allow a small tolerance on the normalization
    assert jnp.allclose(jnp.sum(out, axis=-1), 1.0, atol=5e-3)
    assert jnp.allclose(out, ref, atol=5e-3, rtol=5e-3)

    print("KERNEL_OK")
</pallas_src>

<mosaic_0001>
module attributes {stable_mosaic.version = 11 : i64} {
  func.func @_mlp_kernel(%arg0: i32, %arg1: memref<4x5xf32, #tpu.memory_space<smem>>, %arg2: memref<5xf32, #tpu.memory_space<smem>>, %arg3: memref<5x5xf32, #tpu.memory_space<smem>>, %arg4: memref<5xf32, #tpu.memory_space<smem>>, %arg5: memref<5x3xf32, #tpu.memory_space<smem>>, %arg6: memref<3xf32, #tpu.memory_space<smem>>, %arg7: memref<4x128xf32, #tpu.memory_space<vmem>>, %arg8: memref<3x128xf32, #tpu.memory_space<vmem>>) attributes {dimension_semantics = [#tpu.dimension_semantics<parallel>], iteration_bounds = array<i64: 3>, scalar_prefetch = 0 : i64, scratch_operands = 0 : i64, tpu.core_type = #tpu.core_type<tc>, window_params = [{transform_indices = @transform_0, window_bounds = array<i64: 4, 5>}, {transform_indices = @transform_1, window_bounds = array<i64: 5>}, {transform_indices = @transform_2, window_bounds = array<i64: 5, 5>}, {transform_indices = @transform_3, window_bounds = array<i64: 5>}, {transform_indices = @transform_4, window_bounds = array<i64: 5, 3>}, {transform_indices = @transform_5, window_bounds = array<i64: 3>}, {transform_indices = @transform_6, window_bounds = array<i64: 4, 128>}, {transform_indices = @transform_7, window_bounds = array<i64: 3, 128>}]} {
    %c0 = arith.constant 0 : index
    %c0_0 = arith.constant 0 : index
    %0 = vector.load %arg7[%c0, %c0_0] : memref<4x128xf32, #tpu.memory_space<vmem>>, vector<1x128xf32>
    %c1 = arith.constant 1 : index
    %c0_1 = arith.constant 0 : index
    %1 = vector.load %arg7[%c1, %c0_1] : memref<4x128xf32, #tpu.memory_space<vmem>>, vector<1x128xf32>
    %c2 = arith.constant 2 : index
    %c0_2 = arith.constant 0 : index
    %2 = vector.load %arg7[%c2, %c0_2] : memref<4x128xf32, #tpu.memory_space<vmem>>, vector<1x128xf32>
    %c3 = arith.constant 3 : index
    %c0_3 = arith.constant 0 : index
    %3 = vector.load %arg7[%c3, %c0_3] : memref<4x128xf32, #tpu.memory_space<vmem>>, vector<1x128xf32>
    %c0_4 = arith.constant 0 : index
    %c0_5 = arith.constant 0 : index
    %4 = memref.load %arg1[%c0_4, %c0_5] : memref<4x5xf32, #tpu.memory_space<smem>>
    %5 = vector.broadcast %4 : f32 to vector<1x128xf32>
    %6 = arith.mulf %0, %5 : vector<1x128xf32>
    %c0_6 = arith.constant 0 : index
    %7 = memref.load %arg2[%c0_6] : memref<5xf32, #tpu.memory_space<smem>>
    %8 = vector.broadcast %7 : f32 to vector<1x128xf32>
    %9 = arith.addf %6, %8 : vector<1x128xf32>
    %c1_7 = arith.constant 1 : index
    %c0_8 = arith.constant 0 : index
    %10 = memref.load %arg1[%c1_7, %c0_8] : memref<4x5xf32, #tpu.memory_space<smem>>
    %11 = vector.broadcast %10 : f32 to vector<1x128xf32>
    %12 = arith.mulf %1, %11 : vector<1x128xf32>
    %13 = arith.addf %9, %12 : vector<1x128xf32>
    %c2_9 = arith.constant 2 : index
    %c0_10 = arith.constant 0 : index
    %14 = memref.load %arg1[%c2_9, %c0_10] : memref<4x5xf32, #tpu.memory_space<smem>>
    %15 = vector.broadcast %14 : f32 to vector<1x128xf32>
    %16 = arith.mulf %2, %15 : vector<1x128xf32>
    %17 = arith.addf %13, %16 : vector<1x128xf32>
    %c3_11 = arith.constant 3 : index
    %c0_12 = arith.constant 0 : index
    %18 = memref.load %arg1[%c3_11, %c0_12] : memref<4x5xf32, #tpu.memory_space<smem>>
    %19 = vector.broadcast %18 : f32 to vector<1x128xf32>
    %20 = arith.mulf %3, %19 : vector<1x128xf32>
    %21 = arith.addf %17, %20 : vector<1x128xf32>
    %c0_13 = arith.constant 0 : index
    %c1_14 = arith.constant 1 : index
    %22 = memref.load %arg1[%c0_13, %c1_14] : memref<4x5xf32, #tpu.memory_space<smem>>
    %23 = vector.broadcast %22 : f32 to vector<1x128xf32>
    %24 = arith.mulf %0, %23 : vector<1x128xf32>
    %c1_15 = arith.constant 1 : index
    %25 = memref.load %arg2[%c1_15] : memref<5xf32, #tpu.memory_space<smem>>
    %26 = vector.broadcast %25 : f32 to vector<1x128xf32>
    %27 = arith.addf %24, %26 : vector<1x128xf32>
    %c1_16 = arith.constant 1 : index
    %c1_17 = arith.constant 1 : index
    %28 = memref.load %arg1[%c1_16, %c1_17] : memref<4x5xf32, #tpu.memory_space<smem>>
    %29 = vector.broadcast %28 : f32 to vector<1x128xf32>
    %30 = arith.mulf %1, %29 : vector<1x128xf32>
    %31 = arith.addf %27, %30 : vector<1x128xf32>
    %c2_18 = arith.constant 2 : index
    %c1_19 = arith.constant 1 : index
    %32 = memref.load %arg1[%c2_18, %c1_19] : memref<4x5xf32, #tpu.memory_space<smem>>
    %33 = vector.broadcast %32 : f32 to vector<1x128xf32>
    %34 = arith.mulf %2, %33 : vector<1x128xf32>
    %35 = arith.addf %31, %34 : vector<1x128xf32>
    %c3_20 = arith.constant 3 : index
    %c1_21 = arith.constant 1 : index
    %36 = memref.load %arg1[%c3_20, %c1_21] : memref<4x5xf32, #tpu.memory_space<smem>>
    %37 = vector.broadcast %36 : f32 to vector<1x128xf32>
    %38 = arith.mulf %3, %37 : vector<1x128xf32>
    %39 = arith.addf %35, %38 : vector<1x128xf32>
    %c0_22 = arith.constant 0 : index
    %c2_23 = arith.constant 2 : index
    %40 = memref.load %arg1[%c0_22, %c2_23] : memref<4x5xf32, #tpu.memory_space<smem>>
    %41 = vector.broadcast %40 : f32 to vector<1x128xf32>
    %42 = arith.mulf %0, %41 : vector<1x128xf32>
    %c2_24 = arith.constant 2 : index
    %43 = memref.load %arg2[%c2_24] : memref<5xf32, #tpu.memory_space<smem>>
    %44 = vector.broadcast %43 : f32 to vector<1x128xf32>
    %45 = arith.addf %42, %44 : vector<1x128xf32>
    %c1_25 = arith.constant 1 : index
    %c2_26 = arith.constant 2 : index
    %46 = memref.load %arg1[%c1_25, %c2_26] : memref<4x5xf32, #tpu.memory_space<smem>>
    %47 = vector.broadcast %46 : f32 to vector<1x128xf32>
    %48 = arith.mulf %1, %47 : vector<1x128xf32>
    %49 = arith.addf %45, %48 : vector<1x128xf32>
    %c2_27 = arith.constant 2 : index
    %c2_28 = arith.constant 2 : index
    %50 = memref.load %arg1[%c2_27, %c2_28] : memref<4x5xf32, #tpu.memory_space<smem>>
    %51 = vector.broadcast %50 : f32 to vector<1x128xf32>
    %52 = arith.mulf %2, %51 : vector<1x128xf32>
    %53 = arith.addf %49, %52 : vector<1x128xf32>
    %c3_29 = arith.constant 3 : index
    %c2_30 = arith.constant 2 : index
    %54 = memref.load %arg1[%c3_29, %c2_30] : memref<4x5xf32, #tpu.memory_space<smem>>
    %55 = vector.broadcast %54 : f32 to vector<1x128xf32>
    %56 = arith.mulf %3, %55 : vector<1x128xf32>
    %57 = arith.addf %53, %56 : vector<1x128xf32>
    %c0_31 = arith.constant 0 : index
    %c3_32 = arith.constant 3 : index
    %58 = memref.load %arg1[%c0_31, %c3_32] : memref<4x5xf32, #tpu.memory_space<smem>>
    %59 = vector.broadcast %58 : f32 to vector<1x128xf32>
    %60 = arith.mulf %0, %59 : vector<1x128xf32>
    %c3_33 = arith.constant 3 : index
    %61 = memref.load %arg2[%c3_33] : memref<5xf32, #tpu.memory_space<smem>>
    %62 = vector.broadcast %61 : f32 to vector<1x128xf32>
    %63 = arith.addf %60, %62 : vector<1x128xf32>
    %c1_34 = arith.constant 1 : index
    %c3_35 = arith.constant 3 : index
    %64 = memref.load %arg1[%c1_34, %c3_35] : memref<4x5xf32, #tpu.memory_space<smem>>
    %65 = vector.broadcast %64 : f32 to vector<1x128xf32>
    %66 = arith.mulf %1, %65 : vector<1x128xf32>
    %67 = arith.addf %63, %66 : vector<1x128xf32>
    %c2_36 = arith.constant 2 : index
    %c3_37 = arith.constant 3 : index
    %68 = memref.load %arg1[%c2_36, %c3_37] : memref<4x5xf32, #tpu.memory_space<smem>>
    %69 = vector.broadcast %68 : f32 to vector<1x128xf32>
    %70 = arith.mulf %2, %69 : vector<1x128xf32>
    %71 = arith.addf %67, %70 : vector<1x128xf32>
    %c3_38 = arith.constant 3 : index
    %c3_39 = arith.constant 3 : index
    %72 = memref.load %arg1[%c3_38, %c3_39] : memref<4x5xf32, #tpu.memory_space<smem>>
    %73 = vector.broadcast %72 : f32 to vector<1x128xf32>
    %74 = arith.mulf %3, %73 : vector<1x128xf32>
    %75 = arith.addf %71, %74 : vector<1x128xf32>
    %c0_40 = arith.constant 0 : index
    %c4 = arith.constant 4 : index
    %76 = memref.load %arg1[%c0_40, %c4] : memref<4x5xf32, #tpu.memory_space<smem>>
    %77 = vector.broadcast %76 : f32 to vector<1x128xf32>
    %78 = arith.mulf %0, %77 : vector<1x128xf32>
    %c4_41 = arith.constant 4 : index
    %79 = memref.load %arg2[%c4_41] : memref<5xf32, #tpu.memory_space<smem>>
    %80 = vector.broadcast %79 : f32 to vector<1x128xf32>
    %81 = arith.addf %78, %80 : vector<1x128xf32>
    %c1_42 = arith.constant 1 : index
    %c4_43 = arith.constant 4 : index
    %82 = memref.load %arg1[%c1_42, %c4_43] : memref<4x5xf32, #tpu.memory_space<smem>>
    %83 = vector.broadcast %82 : f32 to vector<1x128xf32>
    %84 = arith.mulf %1, %83 : vector<1x128xf32>
    %85 = arith.addf %81, %84 : vector<1x128xf32>
    %c2_44 = arith.constant 2 : index
    %c4_45 = arith.constant 4 : index
    %86 = memref.load %arg1[%c2_44, %c4_45] : memref<4x5xf32, #tpu.memory_space<smem>>
    %87 = vector.broadcast %86 : f32 to vector<1x128xf32>
    %88 = arith.mulf %2, %87 : vector<1x128xf32>
    %89 = arith.addf %85, %88 : vector<1x128xf32>
    %c3_46 = arith.constant 3 : index
    %c4_47 = arith.constant 4 : index
    %90 = memref.load %arg1[%c3_46, %c4_47] : memref<4x5xf32, #tpu.memory_space<smem>>
    %91 = vector.broadcast %90 : f32 to vector<1x128xf32>
    %92 = arith.mulf %3, %91 : vector<1x128xf32>
    %93 = arith.addf %89, %92 : vector<1x128xf32>
    %cst = arith.constant 0.000000e+00 : f32
    %94 = vector.broadcast %cst : f32 to vector<1x128xf32>
    %95 = arith.maximumf %21, %94 : vector<1x128xf32>
    %cst_48 = arith.constant 0.000000e+00 : f32
    %96 = vector.broadcast %cst_48 : f32 to vector<1x128xf32>
    %97 = arith.maximumf %39, %96 : vector<1x128xf32>
    %cst_49 = arith.constant 0.000000e+00 : f32
    %98 = vector.broadcast %cst_49 : f32 to vector<1x128xf32>
    %99 = arith.maximumf %57, %98 : vector<1x128xf32>
    %cst_50 = arith.constant 0.000000e+00 : f32
    %100 = vector.broadcast %cst_50 : f32 to vector<1x128xf32>
    %101 = arith.maximumf %75, %100 : vector<1x128xf32>
    %cst_51 = arith.constant 0.000000e+00 : f32
    %102 = vector.broadcast %cst_51 : f32 to vector<1x128xf32>
    %103 = arith.maximumf %93, %102 : vector<1x128xf32>
    %c0_52 = arith.constant 0 : index
    %c0_53 = arith.constant 0 : index
    %104 = memref.load %arg3[%c0_52, %c0_53] : memref<5x5xf32, #tpu.memory_space<smem>>
    %105 = vector.broadcast %104 : f32 to vector<1x128xf32>
    %106 = arith.mulf %95, %105 : vector<1x128xf32>
    %c0_54 = arith.constant 0 : index
    %107 = memref.load %arg4[%c0_54] : memref<5xf32, #tpu.memory_space<smem>>
    %108 = vector.broadcast %107 : f32 to vector<1x128xf32>
    %109 = arith.addf %106, %108 : vector<1x128xf32>
    %c1_55 = arith.constant 1 : index
    %c0_56 = arith.constant 0 : index
    %110 = memref.load %arg3[%c1_55, %c0_56] : memref<5x5xf32, #tpu.memory_space<smem>>
    %111 = vector.broadcast %110 : f32 to vector<1x128xf32>
    %112 = arith.mulf %97, %111 : vector<1x128xf32>
    %113 = arith.addf %109, %112 : vector<1x128xf32>
    %c2_57 = arith.constant 2 : index
    %c0_58 = arith.constant 0 : index
    %114 = memref.load %arg3[%c2_57, %c0_58] : memref<5x5xf32, #tpu.memory_space<smem>>
    %115 = vector.broadcast %114 : f32 to vector<1x128xf32>
    %116 = arith.mulf %99, %115 : vector<1x128xf32>
    %117 = arith.addf %113, %116 : vector<1x128xf32>
    %c3_59 = arith.constant 3 : index
    %c0_60 = arith.constant 0 : index
    %118 = memref.load %arg3[%c3_59, %c0_60] : memref<5x5xf32, #tpu.memory_space<smem>>
    %119 = vector.broadcast %118 : f32 to vector<1x128xf32>
    %120 = arith.mulf %101, %119 : vector<1x128xf32>
    %121 = arith.addf %117, %120 : vector<1x128xf32>
    %c4_61 = arith.constant 4 : index
    %c0_62 = arith.constant 0 : index
    %122 = memref.load %arg3[%c4_61, %c0_62] : memref<5x5xf32, #tpu.memory_space<smem>>
    %123 = vector.broadcast %122 : f32 to vector<1x128xf32>
    %124 = arith.mulf %103, %123 : vector<1x128xf32>
    %125 = arith.addf %121, %124 : vector<1x128xf32>
    %c0_63 = arith.constant 0 : index
    %c1_64 = arith.constant 1 : index
    %126 = memref.load %arg3[%c0_63, %c1_64] : memref<5x5xf32, #tpu.memory_space<smem>>
    %127 = vector.broadcast %126 : f32 to vector<1x128xf32>
    %128 = arith.mulf %95, %127 : vector<1x128xf32>
    %c1_65 = arith.constant 1 : index
    %129 = memref.load %arg4[%c1_65] : memref<5xf32, #tpu.memory_space<smem>>
    %130 = vector.broadcast %129 : f32 to vector<1x128xf32>
    %131 = arith.addf %128, %130 : vector<1x128xf32>
    %c1_66 = arith.constant 1 : index
    %c1_67 = arith.constant 1 : index
    %132 = memref.load %arg3[%c1_66, %c1_67] : memref<5x5xf32, #tpu.memory_space<smem>>
    %133 = vector.broadcast %132 : f32 to vector<1x128xf32>
    %134 = arith.mulf %97, %133 : vector<1x128xf32>
    %135 = arith.addf %131, %134 : vector<1x128xf32>
    %c2_68 = arith.constant 2 : index
    %c1_69 = arith.constant 1 : index
    %136 = memref.load %arg3[%c2_68, %c1_69] : memref<5x5xf32, #tpu.memory_space<smem>>
    %137 = vector.broadcast %136 : f32 to vector<1x128xf32>
    %138 = arith.mulf %99, %137 : vector<1x128xf32>
    %139 = arith.addf %135, %138 : vector<1x128xf32>
    %c3_70 = arith.constant 3 : index
    %c1_71 = arith.constant 1 : index
    %140 = memref.load %arg3[%c3_70, %c1_71] : memref<5x5xf32, #tpu.memory_space<smem>>
    %141 = vector.broadcast %140 : f32 to vector<1x128xf32>
    %142 = arith.mulf %101, %141 : vector<1x128xf32>
    %143 = arith.addf %139, %142 : vector<1x128xf32>
    %c4_72 = arith.constant 4 : index
    %c1_73 = arith.constant 1 : index
    %144 = memref.load %arg3[%c4_72, %c1_73] : memref<5x5xf32, #tpu.memory_space<smem>>
    %145 = vector.broadcast %144 : f32 to vector<1x128xf32>
    %146 = arith.mulf %103, %145 : vector<1x128xf32>
    %147 = arith.addf %143, %146 : vector<1x128xf32>
    %c0_74 = arith.constant 0 : index
    %c2_75 = arith.constant 2 : index
    %148 = memref.load %arg3[%c0_74, %c2_75] : memref<5x5xf32, #tpu.memory_space<smem>>
    %149 = vector.broadcast %148 : f32 to vector<1x128xf32>
    %150 = arith.mulf %95, %149 : vector<1x128xf32>
    %c2_76 = arith.constant 2 : index
    %151 = memref.load %arg4[%c2_76] : memref<5xf32, #tpu.memory_space<smem>>
    %152 = vector.broadcast %151 : f32 to vector<1x128xf32>
    %153 = arith.addf %150, %152 : vector<1x128xf32>
    %c1_77 = arith.constant 1 : index
    %c2_78 = arith.constant 2 : index
    %154 = memref.load %arg3[%c1_77, %c2_78] : memref<5x5xf32, #tpu.memory_space<smem>>
    %155 = vector.broadcast %154 : f32 to vector<1x128xf32>
    %156 = arith.mulf %97, %155 : vector<1x128xf32>
    %157 = arith.addf %153, %156 : vector<1x128xf32>
    %c2_79 = arith.constant 2 : index
    %c2_80 = arith.constant 2 : index
    %158 = memref.load %arg3[%c2_79, %c2_80] : memref<5x5xf32, #tpu.memory_space<smem>>
    %159 = vector.broadcast %158 : f32 to vector<1x128xf32>
    %160 = arith.mulf %99, %159 : vector<1x128xf32>
    %161 = arith.addf %157, %160 : vector<1x128xf32>
    %c3_81 = arith.constant 3 : index
    %c2_82 = arith.constant 2 : index
    %162 = memref.load %arg3[%c3_81, %c2_82] : memref<5x5xf32, #tpu.memory_space<smem>>
    %163 = vector.broadcast %162 : f32 to vector<1x128xf32>
    %164 = arith.mulf %101, %163 : vector<1x128xf32>
    %165 = arith.addf %161, %164 : vector<1x128xf32>
    %c4_83 = arith.constant 4 : index
    %c2_84 = arith.constant 2 : index
    %166 = memref.load %arg3[%c4_83, %c2_84] : memref<5x5xf32, #tpu.memory_space<smem>>
    %167 = vector.broadcast %166 : f32 to vector<1x128xf32>
    %168 = arith.mulf %103, %167 : vector<1x128xf32>
    %169 = arith.addf %165, %168 : vector<1x128xf32>
    %c0_85 = arith.constant 0 : index
    %c3_86 = arith.constant 3 : index
    %170 = memref.load %arg3[%c0_85, %c3_86] : memref<5x5xf32, #tpu.memory_space<smem>>
    %171 = vector.broadcast %170 : f32 to vector<1x128xf32>
    %172 = arith.mulf %95, %171 : vector<1x128xf32>
    %c3_87 = arith.constant 3 : index
    %173 = memref.load %arg4[%c3_87] : memref<5xf32, #tpu.memory_space<smem>>
    %174 = vector.broadcast %173 : f32 to vector<1x128xf32>
    %175 = arith.addf %172, %174 : vector<1x128xf32>
    %c1_88 = arith.constant 1 : index
    %c3_89 = arith.constant 3 : index
    %176 = memref.load %arg3[%c1_88, %c3_89] : memref<5x5xf32, #tpu.memory_space<smem>>
    %177 = vector.broadcast %176 : f32 to vector<1x128xf32>
    %178 = arith.mulf %97, %177 : vector<1x128xf32>
    %179 = arith.addf %175, %178 : vector<1x128xf32>
    %c2_90 = arith.constant 2 : index
    %c3_91 = arith.constant 3 : index
    %180 = memref.load %arg3[%c2_90, %c3_91] : memref<5x5xf32, #tpu.memory_space<smem>>
    %181 = vector.broadcast %180 : f32 to vector<1x128xf32>
    %182 = arith.mulf %99, %181 : vector<1x128xf32>
    %183 = arith.addf %179, %182 : vector<1x128xf32>
    %c3_92 = arith.constant 3 : index
    %c3_93 = arith.constant 3 : index
    %184 = memref.load %arg3[%c3_92, %c3_93] : memref<5x5xf32, #tpu.memory_space<smem>>
    %185 = vector.broadcast %184 : f32 to vector<1x128xf32>
    %186 = arith.mulf %101, %185 : vector<1x128xf32>
    %187 = arith.addf %183, %186 : vector<1x128xf32>
    %c4_94 = arith.constant 4 : index
    %c3_95 = arith.constant 3 : index
    %188 = memref.load %arg3[%c4_94, %c3_95] : memref<5x5xf32, #tpu.memory_space<smem>>
    %189 = vector.broadcast %188 : f32 to vector<1x128xf32>
    %190 = arith.mulf %103, %189 : vector<1x128xf32>
    %191 = arith.addf %187, %190 : vector<1x128xf32>
    %c0_96 = arith.constant 0 : index
    %c4_97 = arith.constant 4 : index
    %192 = memref.load %arg3[%c0_96, %c4_97] : memref<5x5xf32, #tpu.memory_space<smem>>
    %193 = vector.broadcast %192 : f32 to vector<1x128xf32>
    %194 = arith.mulf %95, %193 : vector<1x128xf32>
    %c4_98 = arith.constant 4 : index
    %195 = memref.load %arg4[%c4_98] : memref<5xf32, #tpu.memory_space<smem>>
    %196 = vector.broadcast %195 : f32 to vector<1x128xf32>
    %197 = arith.addf %194, %196 : vector<1x128xf32>
    %c1_99 = arith.constant 1 : index
    %c4_100 = arith.constant 4 : index
    %198 = memref.load %arg3[%c1_99, %c4_100] : memref<5x5xf32, #tpu.memory_space<smem>>
    %199 = vector.broadcast %198 : f32 to vector<1x128xf32>
    %200 = arith.mulf %97, %199 : vector<1x128xf32>
    %201 = arith.addf %197, %200 : vector<1x128xf32>
    %c2_101 = arith.constant 2 : index
    %c4_102 = arith.constant 4 : index
    %202 = memref.load %arg3[%c2_101, %c4_102] : memref<5x5xf32, #tpu.memory_space<smem>>
    %203 = vector.broadcast %202 : f32 to vector<1x128xf32>
    %204 = arith.mulf %99, %203 : vector<1x128xf32>
    %205 = arith.addf %201, %204 : vector<1x128xf32>
    %c3_103 = arith.constant 3 : index
    %c4_104 = arith.constant 4 : index
    %206 = memref.load %arg3[%c3_103, %c4_104] : memref<5x5xf32, #tpu.memory_space<smem>>
    %207 = vector.broadcast %206 : f32 to vector<1x128xf32>
    %208 = arith.mulf %101, %207 : vector<1x128xf32>
    %209 = arith.addf %205, %208 : vector<1x128xf32>
    %c4_105 = arith.constant 4 : index
    %c4_106 = arith.constant 4 : index
    %210 = memref.load %arg3[%c4_105, %c4_106] : memref<5x5xf32, #tpu.memory_space<smem>>
    %211 = vector.broadcast %210 : f32 to vector<1x128xf32>
    %212 = arith.mulf %103, %211 : vector<1x128xf32>
    %213 = arith.addf %209, %212 : vector<1x128xf32>
    %cst_107 = arith.constant 0.000000e+00 : f32
    %214 = vector.broadcast %cst_107 : f32 to vector<1x128xf32>
    %215 = arith.maximumf %125, %214 : vector<1x128xf32>
    %cst_108 = arith.constant 0.000000e+00 : f32
    %216 = vector.broadcast %cst_108 : f32 to vector<1x128xf32>
    %217 = arith.maximumf %147, %216 : vector<1x128xf32>
    %cst_109 = arith.constant 0.000000e+00 : f32
    %218 = vector.broadcast %cst_109 : f32 to vector<1x128xf32>
    %219 = arith.maximumf %169, %218 : vector<1x128xf32>
    %cst_110 = arith.constant 0.000000e+00 : f32
    %220 = vector.broadcast %cst_110 : f32 to vector<1x128xf32>
    %221 = arith.maximumf %191, %220 : vector<1x128xf32>
    %cst_111 = arith.constant 0.000000e+00 : f32
    %222 = vector.broadcast %cst_111 : f32 to vector<1x128xf32>
    %223 = arith.maximumf %213, %222 : vector<1x128xf32>
    %c0_112 = arith.constant 0 : index
    %c0_113 = arith.constant 0 : index
    %224 = memref.load %arg5[%c0_112, %c0_113] : memref<5x3xf32, #tpu.memory_space<smem>>
    %225 = vector.broadcast %224 : f32 to vector<1x128xf32>
    %226 = arith.mulf %215, %225 : vector<1x128xf32>
    %c0_114 = arith.constant 0 : index
    %227 = memref.load %arg6[%c0_114] : memref<3xf32, #tpu.memory_space<smem>>
    %228 = vector.broadcast %227 : f32 to vector<1x128xf32>
    %229 = arith.addf %226, %228 : vector<1x128xf32>
    %c1_115 = arith.constant 1 : index
    %c0_116 = arith.constant 0 : index
    %230 = memref.load %arg5[%c1_115, %c0_116] : memref<5x3xf32, #tpu.memory_space<smem>>
    %231 = vector.broadcast %230 : f32 to vector<1x128xf32>
    %232 = arith.mulf %217, %231 : vector<1x128xf32>
    %233 = arith.addf %229, %232 : vector<1x128xf32>
    %c2_117 = arith.constant 2 : index
    %c0_118 = arith.constant 0 : index
    %234 = memref.load %arg5[%c2_117, %c0_118] : memref<5x3xf32, #tpu.memory_space<smem>>
    %235 = vector.broadcast %234 : f32 to vector<1x128xf32>
    %236 = arith.mulf %219, %235 : vector<1x128xf32>
    %237 = arith.addf %233, %236 : vector<1x128xf32>
    %c3_119 = arith.constant 3 : index
    %c0_120 = arith.constant 0 : index
    %238 = memref.load %arg5[%c3_119, %c0_120] : memref<5x3xf32, #tpu.memory_space<smem>>
    %239 = vector.broadcast %238 : f32 to vector<1x128xf32>
    %240 = arith.mulf %221, %239 : vector<1x128xf32>
    %241 = arith.addf %237, %240 : vector<1x128xf32>
    %c4_121 = arith.constant 4 : index
    %c0_122 = arith.constant 0 : index
    %242 = memref.load %arg5[%c4_121, %c0_122] : memref<5x3xf32, #tpu.memory_space<smem>>
    %243 = vector.broadcast %242 : f32 to vector<1x128xf32>
    %244 = arith.mulf %223, %243 : vector<1x128xf32>
    %245 = arith.addf %241, %244 : vector<1x128xf32>
    %c0_123 = arith.constant 0 : index
    %c1_124 = arith.constant 1 : index
    %246 = memref.load %arg5[%c0_123, %c1_124] : memref<5x3xf32, #tpu.memory_space<smem>>
    %247 = vector.broadcast %246 : f32 to vector<1x128xf32>
    %248 = arith.mulf %215, %247 : vector<1x128xf32>
    %c1_125 = arith.constant 1 : index
    %249 = memref.load %arg6[%c1_125] : memref<3xf32, #tpu.memory_space<smem>>
    %250 = vector.broadcast %249 : f32 to vector<1x128xf32>
    %251 = arith.addf %248, %250 : vector<1x128xf32>
    %c1_126 = arith.constant 1 : index
    %c1_127 = arith.constant 1 : index
    %252 = memref.load %arg5[%c1_126, %c1_127] : memref<5x3xf32, #tpu.memory_space<smem>>
    %253 = vector.broadcast %252 : f32 to vector<1x128xf32>
    %254 = arith.mulf %217, %253 : vector<1x128xf32>
    %255 = arith.addf %251, %254 : vector<1x128xf32>
    %c2_128 = arith.constant 2 : index
    %c1_129 = arith.constant 1 : index
    %256 = memref.load %arg5[%c2_128, %c1_129] : memref<5x3xf32, #tpu.memory_space<smem>>
    %257 = vector.broadcast %256 : f32 to vector<1x128xf32>
    %258 = arith.mulf %219, %257 : vector<1x128xf32>
    %259 = arith.addf %255, %258 : vector<1x128xf32>
    %c3_130 = arith.constant 3 : index
    %c1_131 = arith.constant 1 : index
    %260 = memref.load %arg5[%c3_130, %c1_131] : memref<5x3xf32, #tpu.memory_space<smem>>
    %261 = vector.broadcast %260 : f32 to vector<1x128xf32>
    %262 = arith.mulf %221, %261 : vector<1x128xf32>
    %263 = arith.addf %259, %262 : vector<1x128xf32>
    %c4_132 = arith.constant 4 : index
    %c1_133 = arith.constant 1 : index
    %264 = memref.load %arg5[%c4_132, %c1_133] : memref<5x3xf32, #tpu.memory_space<smem>>
    %265 = vector.broadcast %264 : f32 to vector<1x128xf32>
    %266 = arith.mulf %223, %265 : vector<1x128xf32>
    %267 = arith.addf %263, %266 : vector<1x128xf32>
    %c0_134 = arith.constant 0 : index
    %c2_135 = arith.constant 2 : index
    %268 = memref.load %arg5[%c0_134, %c2_135] : memref<5x3xf32, #tpu.memory_space<smem>>
    %269 = vector.broadcast %268 : f32 to vector<1x128xf32>
    %270 = arith.mulf %215, %269 : vector<1x128xf32>
    %c2_136 = arith.constant 2 : index
    %271 = memref.load %arg6[%c2_136] : memref<3xf32, #tpu.memory_space<smem>>
    %272 = vector.broadcast %271 : f32 to vector<1x128xf32>
    %273 = arith.addf %270, %272 : vector<1x128xf32>
    %c1_137 = arith.constant 1 : index
    %c2_138 = arith.constant 2 : index
    %274 = memref.load %arg5[%c1_137, %c2_138] : memref<5x3xf32, #tpu.memory_space<smem>>
    %275 = vector.broadcast %274 : f32 to vector<1x128xf32>
    %276 = arith.mulf %217, %275 : vector<1x128xf32>
    %277 = arith.addf %273, %276 : vector<1x128xf32>
    %c2_139 = arith.constant 2 : index
    %c2_140 = arith.constant 2 : index
    %278 = memref.load %arg5[%c2_139, %c2_140] : memref<5x3xf32, #tpu.memory_space<smem>>
    %279 = vector.broadcast %278 : f32 to vector<1x128xf32>
    %280 = arith.mulf %219, %279 : vector<1x128xf32>
    %281 = arith.addf %277, %280 : vector<1x128xf32>
    %c3_141 = arith.constant 3 : index
    %c2_142 = arith.constant 2 : index
    %282 = memref.load %arg5[%c3_141, %c2_142] : memref<5x3xf32, #tpu.memory_space<smem>>
    %283 = vector.broadcast %282 : f32 to vector<1x128xf32>
    %284 = arith.mulf %221, %283 : vector<1x128xf32>
    %285 = arith.addf %281, %284 : vector<1x128xf32>
    %c4_143 = arith.constant 4 : index
    %c2_144 = arith.constant 2 : index
    %286 = memref.load %arg5[%c4_143, %c2_144] : memref<5x3xf32, #tpu.memory_space<smem>>
    %287 = vector.broadcast %286 : f32 to vector<1x128xf32>
    %288 = arith.mulf %223, %287 : vector<1x128xf32>
    %289 = arith.addf %285, %288 : vector<1x128xf32>
    %290 = arith.maximumf %245, %267 : vector<1x128xf32>
    %291 = arith.maximumf %290, %289 : vector<1x128xf32>
    %292 = arith.subf %245, %291 : vector<1x128xf32>
    %293 = math.exp %292 : vector<1x128xf32>
    %294 = arith.subf %267, %291 : vector<1x128xf32>
    %295 = math.exp %294 : vector<1x128xf32>
    %296 = arith.subf %289, %291 : vector<1x128xf32>
    %297 = math.exp %296 : vector<1x128xf32>
    %298 = arith.addf %293, %295 : vector<1x128xf32>
    %299 = arith.addf %298, %297 : vector<1x128xf32>
    %300 = tpu.reciprocal %299 {approx = true} : vector<1x128xf32> -> vector<1x128xf32>
    %301 = arith.mulf %293, %300 : vector<1x128xf32>
    %c0_145 = arith.constant 0 : index
    %c0_146 = arith.constant 0 : index
    %302 = vector.load %arg8[%c0_145, %c0_146] : memref<3x128xf32, #tpu.memory_space<vmem>>, vector<1x128xf32>
    tpu.vector_store %arg8[%c0_145, %c0_146], %301 {strides = array<i32>} : memref<3x128xf32, #tpu.memory_space<vmem>>, vector<1x128xf32>,
    %303 = arith.mulf %295, %300 : vector<1x128xf32>
    %c1_147 = arith.constant 1 : index
    %c0_148 = arith.constant 0 : index
    %304 = vector.load %arg8[%c1_147, %c0_148] : memref<3x128xf32, #tpu.memory_space<vmem>>, vector<1x128xf32>
    tpu.vector_store %arg8[%c1_147, %c0_148], %303 {strides = array<i32>} : memref<3x128xf32, #tpu.memory_space<vmem>>, vector<1x128xf32>,
    %305 = arith.mulf %297, %300 : vector<1x128xf32>
    %c2_149 = arith.constant 2 : index
    %c0_150 = arith.constant 0 : index
    %306 = vector.load %arg8[%c2_149, %c0_150] : memref<3x128xf32, #tpu.memory_space<vmem>>, vector<1x128xf32>
    tpu.vector_store %arg8[%c2_149, %c0_150], %305 {strides = array<i32>} : memref<3x128xf32, #tpu.memory_space<vmem>>, vector<1x128xf32>,
    return
  }
  func.func @transform_0(%arg0: i32) -> (i32, i32) {
    %c0_i32 = arith.constant 0 : i32
    %c0_i32_0 = arith.constant 0 : i32
    %c0_i32_1 = arith.constant 0 : i32
    return %c0_i32, %c0_i32_0 : i32, i32
  }
  func.func @transform_1(%arg0: i32) -> i32 {
    %c0_i32 = arith.constant 0 : i32
    %c0_i32_0 = arith.constant 0 : i32
    return %c0_i32 : i32
  }
  func.func @transform_2(%arg0: i32) -> (i32, i32) {
    %c0_i32 = arith.constant 0 : i32
    %c0_i32_0 = arith.constant 0 : i32
    %c0_i32_1 = arith.constant 0 : i32
    return %c0_i32, %c0_i32_0 : i32, i32
  }
  func.func @transform_3(%arg0: i32) -> i32 {
    %c0_i32 = arith.constant 0 : i32
    %c0_i32_0 = arith.constant 0 : i32
    return %c0_i32 : i32
  }
  func.func @transform_4(%arg0: i32) -> (i32, i32) {
    %c0_i32 = arith.constant 0 : i32
    %c0_i32_0 = arith.constant 0 : i32
    %c0_i32_1 = arith.constant 0 : i32
    return %c0_i32, %c0_i32_0 : i32, i32
  }
  func.func @transform_5(%arg0: i32) -> i32 {
    %c0_i32 = arith.constant 0 : i32
    %c0_i32_0 = arith.constant 0 : i32
    return %c0_i32 : i32
  }
  func.func @transform_6(%arg0: i32) -> (i32, i32) {
    %c0_i32 = arith.constant 0 : i32
    %c0_i32_0 = arith.constant 0 : i32
    return %c0_i32, %arg0 : i32, i32
  }
  func.func @transform_7(%arg0: i32) -> (i32, i32) {
    %c0_i32 = arith.constant 0 : i32
    %c0_i32_0 = arith.constant 0 : i32
    return %c0_i32, %arg0 : i32, i32
  }
}

</mosaic_0001>

<bundles_post_ra>
// kernel: tpu_custom_call.1
= control target key start
LH: loop header
LB: loop body
LE: loop exit
PB: predicated region body
PF: predicated region fallthrough
CT: control target
= control target key end

     0   :  { %12 = vsyncpa [#allocation4], 0  ;;  %s1517_s0 = inlined_call_operand.hbm [shape: f32[4,5], index: 0, kind: input, shape index: {}]   ;;  %s1518_s1 = inlined_call_operand.vmem [shape: f32[5], index: 1, kind: input, shape index: {}]   ;;  %s1519_s2 = inlined_call_operand.vmem [shape: f32[5,5], index: 2, kind: input, shape index: {}]   ;;  %s1520_s3 = inlined_call_operand.vmem [shape: f32[5], index: 3, kind: input, shape index: {}]   ;;  %s1521_s4 = inlined_call_operand.vmem [shape: f32[5,3], index: 4, kind: input, shape index: {}]   ;;  %s1522_s5 = inlined_call_operand.hbm [shape: f32[3], index: 5, kind: input, shape index: {}]   ;;  %s1523_s6 = inlined_call_operand.vmem [shape: f32[4,384], index: 6, kind: input, shape index: {}]   ;;  %s1524_s7 = inlined_call_operand.hbm [shape: f32[3,384], index: 7, kind: output, shape index: {}]  }
   0x1   :  { %13 = vsyncpa [#allocation5], 0 }
   0x2   :  { %14 = vsyncpa [#allocation8], 0 }
   0x3   :  { %15 = vsyncpa [#allocation11], 0 }
   0x4   :  { %16 = vsyncpa [#allocation13], 0 }
   0x5   :  { %17 = vsyncpa [#allocation3], 0 }
   0x6   :  { %19 = vsyncpa [#allocation3 + $0x1], 0  ;;  %s1192_s24 = smov 0   ;;  %s1194_s25 = smov 0  }
   0x7   :  { %s1196_s26 = smov 0   ;;  %s1198_s27 = smov 0  }
   0x8 LB: > { %s1213_s28 = sadd.s32 4294967295, %s1143_s27   ;;  %s784_s29 = sadd.s32 4294967294, %s1143_s27   ;;  %s1143_s27 = sphi %s1198_s27, %s1544_s27   ;;  %s1139_s26 = sphi %s1196_s26, %s1543_s26   ;;  %s1135_s25 = sphi %s1194_s25, %s1542_s25   ;;  %s1131_s24 = sphi %s1192_s24, %s1541_s24  }
   0x9   : > { %s1217_s30 = sadd.s32 1, %s1143_s27   ;;  %s184_s8 = sadd.s32 1, %s1139_s26 }
   0xa   : > { %s181_s9 = ssub.s32 %s1143_s27, %s1217_s30  ;;  %p194_p0 = scmp.ne.s32.totalorder %s1139_s26, %s1135_s25 }
   0xb   : > { %p182_p1 = scmp.eq.s32.totalorder %s181_s9, 0  ;;  %p195_p2 = scmp.eq.s32.totalorder %s1213_s28, 2 }
   0xc   : > { %p200_p3 = scmp.ne.s32.totalorder %s1135_s25, %s1131_s24  ;;  %p201_p4 = scmp.eq.s32.totalorder %s784_s29, 2 }
   0xd   : > { %s1228_s10 = scalar_select %p182_p1, %s1139_s26, %s184_s8  }
   0xe   : > { %p1230_p5 = por %p195_p2, %p194_p0  ;;  %p1234_p6 = por %p201_p4, %p200_p3 }
   0xf   : > { %p785_p7 = scmp.ge.s32.totalorder %s1143_s27, 1  ;;  %p208_p8 = scmp.lt.s32.totalorder %s1143_s27, 4 }
  0x10   : > { %s1527_s12 = scalar_select %p1234_p6, 1, 0 }
  0x11   : > { %p1525_p9 = scmp.eq.s32.totalorder %s1213_s28, 0  ;;  %p1241_p10 = pnand %p785_p7, %p208_p8 }
  0x12   : > { %s241_s16 = sshll.u32 %s1519_s2, 4  ;;  %s230_s19 = sshll.u32 %s1518_s1, 4  ;;  %s242_s16 = int_to_ptr.vmem [resolvable:$true] %s241_s16  ;;  %s231_s19 = int_to_ptr.vmem [resolvable:$true] %s230_s19 }
  0x13   : > { %p899_p11 = pneg %p1241_p10  ;;  %s252_s23 = sshll.u32 %s1520_s3, 4  ;;  %s1262_s23 = int_to_ptr.vmem [resolvable:$true] %s252_s23 }
  0x14   : > { %s981_s29 = scalar_lea.vmem %s242_s16, 128  ;;  %p989_p3 = scmp.lt.s32.totalorder %s242_s16, %s242_s16 }
  0x15   : > { %p1255_p12 = pnand %p1525_p9, %p899_p11  ;;  %p982_p13 = scmp.ne.s32.totalorder %s242_s16, %s981_s29 }
  0x16   : > { %p990_p4 = scmp.lt.s32.totalorder %s981_s29, %s981_s29 }
  0x17   : > { %p983_p0 = pneg %p1255_p12 }
  0x18   : > { %p991_p7 = por %p990_p4, %p989_p3 }
  0x19   : > { %p984_p1 = pnand %p983_p0, %p982_p13 }
  0x1b   : > { %p985_p2 = pneg %p984_p1 }
  0x1d   : > { %p992_p8 = pnand %p991_p7, %p985_p2 }
  0x1f   : > { %995 = shalt.err (!%p992_p8)
}
  0x20   : > { %s1145_s8 = smov [#allocation7]   ;;  %s1146_s9 = smov [#allocation2]  }
  0x21   : > { %908 = dma.vmem_to_smem (!%p1255_p12), %s242_s16, 128, %s1145_s8, [#allocation8]  }
  0x22   : > { %902 = dma.hbm_to_smem (!%p1255_p12), %s1517_s0, 64, %s1146_s9, [#allocation4]  }
  0x23   : > { %s1007_s17 = scalar_lea.vmem %s231_s19, 16  ;;  %p1015_p2 = scmp.lt.s32.totalorder %s231_s19, %s231_s19 }
  0x24   : > { %p1008_p11 = scmp.ne.s32.totalorder %s231_s19, %s1007_s17  ;;  %p1016_p3 = scmp.lt.s32.totalorder %s1007_s17, %s1007_s17 }
  0x26   : > { %p1010_p13 = pnand %p1008_p11, %p983_p0  ;;  %p1017_p4 = por %p1016_p3, %p1015_p2 }
  0x28   : > { %p1011_p1 = pneg %p1010_p13 }
  0x2a   : > { %p1018_p7 = pnand %p1017_p4, %p1011_p1 }
  0x2c   : > { %1021 = shalt.err (!%p1018_p7)
}
  0x2d   : > { %s1147_s18 = smov [#allocation6]   ;;  %s1022_s16 = scalar_lea.vmem %s1262_s23, 16 }
  0x2e   : > { %905 = dma.vmem_to_smem (!%p1255_p12), %s231_s19, 16, %s1147_s18, [#allocation5]  }
  0x2f   : > { %p1023_p8 = scmp.ne.s32.totalorder %s1262_s23, %s1022_s16  ;;  %p1030_p13 = scmp.lt.s32.totalorder %s1262_s23, %s1262_s23 }
  0x30   : > { %p1031_p6 = scmp.lt.s32.totalorder %s1022_s16, %s1022_s16 }
  0x31   : > { %p1025_p9 = pnand %p1023_p8, %p983_p0 }
  0x32   : > { %p1032_p2 = por %p1031_p6, %p1030_p13 }
  0x33   : > { %p1026_p11 = pneg %p1025_p9 }
  0x35   : > { %p1033_p1 = pnand %p1032_p2, %p1026_p11 }
  0x37   : > { %1036 = shalt.err (!%p1033_p1)
}
  0x38   : > { %s1148_s21 = smov [#allocation9]   ;;  %s263_s29 = sshll.u32 %s1521_s4, 4  ;;  %s264_s29 = int_to_ptr.vmem [resolvable:$true] %s263_s29 }
  0x39   : > { %911 = dma.vmem_to_smem (!%p1255_p12), %s1262_s23, 16, %s1148_s21, [#allocation8]  }
  0x3a   : > { %s1037_s8 = scalar_lea.vmem %s264_s29, 128  ;;  %p1045_p6 = scmp.lt.s32.totalorder %s264_s29, %s264_s29 }
  0x3b   : > { %p1038_p3 = scmp.ne.s32.totalorder %s264_s29, %s1037_s8  ;;  %p1046_p7 = scmp.lt.s32.totalorder %s1037_s8, %s1037_s8 }
  0x3d   : > { %p1040_p9 = pnand %p1038_p3, %p983_p0  ;;  %p1047_p8 = por %p1046_p7, %p1045_p6 }
  0x3f   : > { %p1041_p4 = pneg %p1040_p9 }
  0x41   : > { %p1048_p11 = pnand %p1047_p8, %p1041_p4 }
  0x43   : > { %1051 = shalt.err (!%p1048_p11)
}
  0x44   : > { %s1149_s9 = smov [#allocation10]   ;;  %s1150_s23 = smov [#allocation12]  }
  0x45   : > { %914 = dma.vmem_to_smem (!%p1255_p12), %s264_s29, 128, %s1149_s9, [#allocation11]  }
  0x46   : > { %917 = dma.hbm_to_smem (!%p1255_p12), %s1522_s5, 16, %s1150_s23, [#allocation13]  }
  0x47   : > { %292 = sbr.rel (%p1241_p10) target bundleno = 234 (0xea), region = 48  ;;  %p1530_p0 = scmp.eq.s32.totalorder (!%p1241_p10), %s1213_s28, 0 }
  0x4c   : > { %1106 = dma.done.wait (%p1530_p0), [#allocation4], 64   ;;  %p1531_p13 = pmov %p1530_p0 }
  0x4d   : > { %p1532_p2 = pmov %p1530_p0 }
  0x4e   : > { %1108 = vsyncadd (%p1531_p13), [#allocation4], 4294967232 }
  0x4f   : > { %1110 = dma.done.wait (%p1532_p2), [#allocation5], 16   ;;  %p1533_p1 = pmov %p1530_p0 }
  0x50   : > { %p1534_p3 = pmov %p1530_p0 }
  0x51   : > { %1112 = vsyncadd (%p1533_p1), [#allocation5], 4294967280 }
  0x52   : > { %1114 = dma.done.wait (%p1534_p3), [#allocation8], 144   ;;  %p1535_p12 = pmov %p1530_p0 }
  0x53   : > { %p1536_p10 = pmov %p1530_p0 }
  0x54   : > { %1116 = vsyncadd (%p1535_p12), [#allocation8], 4294967152 }
  0x55   : > { %1118 = dma.done.wait (%p1536_p10), [#allocation11], 128   ;;  %p1537_p9 = pmov %p1530_p0 }
  0x56   : > { %p1538_p4 = pmov %p1530_p0 }
  0x57   : > { %1120 = vsyncadd (%p1537_p9), [#allocation11], 4294967168 }
  0x58   : > { %1122 = dma.done.wait (%p1538_p4), [#allocation13], 16   ;;  %p1539_p6 = pmov %p1530_p0 }
  0x5a   : > { %1124 = vsyncadd (%p1539_p6), [#allocation13], 4294967280 }
  0x5b   : > { %318 = sfence }
  0x5c   : > { %p344_p7 = scmp.lt.s32.totalorder %s1213_s28, 2  ;;  %s352_s13 = sld [smem:[#allocation2]] }
  0x5d   : > { %s355_s20 = sld [smem:[#allocation6]] }
  0x5e   : > { %s345_s17 = scalar_select %p344_p7, %s1213_s28, 2 }
  0x5f   : > { %s802_s18 = sld [smem:[#allocation2 + $0x80]] }
  0x60   : > { %s801_s16 = sshll.u32 %s345_s17, 2  ;;  %s1333_s29 = sld [smem:[#allocation2 + $0x100]] }
  0x61   : > { %s1331_s19 = scalar_lea.vmem %s1523_s6, %s801_s16  ;;  %s1335_s8 = sld [smem:[#allocation2 + $0x180]] }
  0x62   : > { %v1338_v0 = vld [vmem:[%s1331_s19] sm:$0x1]  ;;  %v353_v1 = vstv %s352_s13  ;;  %s805_s9 = sld [smem:[#allocation2 + $0x1]]  ;;  %v1342_v3 = vld [vmem:[%s1331_s19 + $0x1] sm:$0x1] }
  0x63   : > { %s806_s23 = sld [smem:[#allocation6 + $0x1]]  ;;  %v354_v2 = vmul.f32 %v353_v1, %v1338_v0  ;;  %v356_v4 = vstv %s355_s20  ;;  %v1349_v11 = vld [vmem:[%s1331_s19 + $0x2] sm:$0x1]  ;;  %v1360_v21 = vld [vmem:[%s1331_s19 + $0x3] sm:$0x1] }
  0x64   : > { %s807_s14 = sld [smem:[#allocation2 + $0x81]] }
  0x65   : > { %s808_s15 = sld [smem:[#allocation2 + $0x101]]  ;;  %v359_v5 = vstv %s802_s18  ;;  %v357_v7 = vadd.f32 %v356_v4, %v354_v2 }
  0x66   : > { %s1344_s17 = sld [smem:[#allocation2 + $0x181]]  ;;  %v360_v8 = vmul.f32 %v359_v5, %v1342_v3  ;;  %v363_v12 = vstv %s1333_s29 }
  0x67   : > { %s810_s16 = sld [smem:[#allocation2 + $0x2]]  ;;  %v364_v18 = vmul.f32 %v363_v12, %v1349_v11  ;;  %v367_v19 = vstv %s1335_s8 }
  0x68   : > { %v371_v6 = vstv %s805_s9  ;;  %s811_s21 = sld [smem:[#allocation6 + $0x2]]  ;;  %v361_v17 = vadd.f32 %v360_v8, %v357_v7  ;;  %v368_v31 = vmul.f32 %v367_v19, %v1360_v21 }
  0x69   : > { %v372_v9 = vmul.f32 %v371_v6, %v1338_v0  ;;  %v374_v10 = vstv %s806_s23  ;;  %s812_s13 = sld [smem:[#allocation2 + $0x82]] }
  0x6a   : > { %v377_v13 = vstv %s807_s14  ;;  %s1352_s20 = sld [smem:[#allocation2 + $0x102]]  ;;  %v365_v30 = vadd.f32 %v364_v18, %v361_v17 }
  0x6b   : > { %v375_v14 = vadd.f32 %v374_v10, %v372_v9  ;;  %v378_v15 = vmul.f32 %v377_v13, %v1342_v3  ;;  %v381_v16 = vstv %s808_s15  ;;  %s1355_s18 = sld [smem:[#allocation2 + $0x182]] }
  0x6c   : > { %s815_s22 = sld [smem:[#allocation2 + $0x3]]  ;;  %v382_v23 = vmul.f32 %v381_v16, %v1349_v11  ;;  %v385_v26 = vstv %s1344_s17  ;;  %v369_v42 = vadd.f32 %v368_v31, %v365_v30 }
  0x6d   : > { %v389_v20 = vstv %s810_s16  ;;  %s816_s9 = sld [smem:[#allocation6 + $0x3]]  ;;  %v379_v22 = vadd.f32 %v378_v15, %v375_v14  ;;  %v386_v34 = vmul.f32 %v385_v26, %v1360_v21 }
  0x6e   : > { %v390_v24 = vmul.f32 %v389_v20, %v1338_v0  ;;  %v392_v25 = vstv %s811_s21  ;;  %s817_s29 = sld [smem:[#allocation2 + $0x83]]  ;;  %v1383_v56 = vmax.f32 %v369_v42, 0.0 }
  0x6f   : > { %v395_v27 = vstv %s812_s13  ;;  %s818_s23 = sld [smem:[#allocation2 + $0x103]]  ;;  %v383_v33 = vadd.f32 %v382_v23, %v379_v22 }
  0x70   : > { %v393_v28 = vadd.f32 %v392_v25, %v390_v24  ;;  %v396_v29 = vmul.f32 %v395_v27, %v1342_v3  ;;  %s1366_s8 = sld [smem:[#allocation2 + $0x183]]  ;;  %v399_v32 = vstv %s1352_s20 }
  0x71   : > { %s820_s19 = sld [smem:[#allocation2 + $0x4]]  ;;  %v400_v39 = vmul.f32 %v399_v32, %v1349_v11  ;;  %v403_v40 = vstv %s1355_s18  ;;  %v387_v46 = vadd.f32 %v386_v34, %v383_v33 }
  0x72   : > { %v407_v35 = vstv %s815_s22  ;;  %s821_s14 = sld [smem:[#allocation6 + $0x4]]  ;;  %v397_v38 = vadd.f32 %v396_v29, %v393_v28  ;;  %v404_v47 = vmul.f32 %v403_v40, %v1360_v21 }
  0x73   : > { %v408_v36 = vmul.f32 %v407_v35, %v1338_v0  ;;  %v410_v37 = vstv %s816_s9  ;;  %s822_s15 = sld [smem:[#allocation2 + $0x84]]  ;;  %v1392_v63 = vmax.f32 %v387_v46, 0.0 }
  0x74   : > { %v413_v41 = vstv %s817_s29  ;;  %s823_s17 = sld [smem:[#allocation2 + $0x104]]  ;;  %v401_v51 = vadd.f32 %v400_v39, %v397_v38 }
  0x75   : > { %v411_v43 = vadd.f32 %v410_v37, %v408_v36  ;;  %v414_v44 = vmul.f32 %v413_v41, %v1342_v3  ;;  %v417_v45 = vstv %s818_s23  ;;  %s1375_s16 = sld [smem:[#allocation2 + $0x184]] }
  0x76   : > { %s447_s21 = sld [smem:[#allocation7]]  ;;  %v418_v49 = vmul.f32 %v417_v45, %v1349_v11  ;;  %v421_v52 = vstv %s1366_s8 }
  0x77   : > { %v415_v48 = vadd.f32 %v414_v44, %v411_v43  ;;  %v425_v50 = vstv %s820_s19  ;;  %s1379_s13 = sld [smem:[#allocation9]]  ;;  %v422_v61 = vmul.f32 %v421_v52, %v1360_v21 }
  0x78   : > { %v426_v53 = vmul.f32 %v425_v50, %v1338_v0  ;;  %v428_v54 = vstv %s821_s14  ;;  %s825_s20 = sld [smem:[#allocation7 + $0x80]]  ;;  %v405_v0 = vadd.f32 %v404_v47, %v401_v51 }
  0x79   : > { %v431_v55 = vstv %s822_s15  ;;  %s1385_s18 = sld [smem:[#allocation7 + $0x100]]  ;;  %v419_v60 = vadd.f32 %v418_v49, %v415_v48 }
  0x7a   : > { %v429_v57 = vadd.f32 %v428_v54, %v426_v53  ;;  %v432_v58 = vmul.f32 %v431_v55, %v1342_v3  ;;  %v435_v59 = vstv %s823_s17  ;;  %s1388_s22 = sld [smem:[#allocation7 + $0x180]]  ;;  %v1402_v10 = vmax.f32 %v405_v0, 0.0 }
  0x7b   : > { %v436_v62 = vmul.f32 %v435_v59, %v1349_v11  ;;  %s1394_s9 = sld [smem:[#allocation7 + $0x200]]  ;;  %v439_v2 = vstv %s1375_s16  ;;  %v423_v7 = vadd.f32 %v422_v61, %v419_v60 }
  0x7c   : > { %v433_v1 = vadd.f32 %v432_v58, %v429_v57  ;;  %v448_v4 = vstv %s447_s21  ;;  %s829_s29 = sld [smem:[#allocation7 + $0x1]]  ;;  %v440_v9 = vmul.f32 %v439_v2, %v1360_v21 }
  0x7d   : > { %v449_v3 = vmul.f32 %v448_v4, %v1383_v56  ;;  %v451_v5 = vstv %s1379_s13  ;;  %s830_s23 = sld [smem:[#allocation9 + $0x1]]  ;;  %v1410_v16 = vmax.f32 %v423_v7, 0.0 }
  0x7e   : > { %v454_v6 = vstv %s825_s20  ;;  %s831_s8 = sld [smem:[#allocation7 + $0x81]]  ;;  %v437_v8 = vadd.f32 %v436_v62, %v433_v1 }
  0x7f   : > { %s1400_s19 = sld [smem:[#allocation7 + $0x101]]  ;;  %v452_v11 = vadd.f32 %v451_v5, %v449_v3  ;;  %v455_v12 = vmul.f32 %v454_v6, %v1392_v63  ;;  %v458_v13 = vstv %s1385_s18 }
  0x80   : > { %s1405_s14 = sld [smem:[#allocation7 + $0x181]]  ;;  %v441_v15 = vadd.f32 %v440_v9, %v437_v8  ;;  %v459_v20 = vmul.f32 %v458_v13, %v1402_v10  ;;  %v462_v21 = vstv %s1388_s22 }
  0x81   : > { %s1408_s15 = sld [smem:[#allocation7 + $0x201]]  ;;  %v456_v19 = vadd.f32 %v455_v12, %v452_v11  ;;  %v463_v26 = vmul.f32 %v462_v21, %v1410_v16  ;;  %v466_v29 = vstv %s1394_s9 }
  0x82   : > { %v470_v14 = vstv %s829_s29  ;;  %s835_s17 = sld [smem:[#allocation7 + $0x2]]  ;;  %v1420_v27 = vmax.f32 %v441_v15, 0.0 }
  0x83   : > { %v471_v17 = vmul.f32 %v470_v14, %v1383_v56  ;;  %v473_v18 = vstv %s830_s23  ;;  %s836_s16 = sld [smem:[#allocation9 + $0x2]]  ;;  %v460_v28 = vadd.f32 %v459_v20, %v456_v19 }
  0x84   : > { %v476_v22 = vstv %s831_s8  ;;  %s837_s21 = sld [smem:[#allocation7 + $0x82]]  ;;  %v467_v41 = vmul.f32 %v466_v29, %v1420_v27 }
  0x85   : > { %v474_v23 = vadd.f32 %v473_v18, %v471_v17  ;;  %v477_v24 = vmul.f32 %v476_v22, %v1392_v63  ;;  %s838_s13 = sld [smem:[#allocation7 + $0x102]]  ;;  %v480_v25 = vstv %s1400_s19  ;;  %v464_v40 = vadd.f32 %v463_v26, %v460_v28 }
  0x86   : > { %s839_s20 = sld [smem:[#allocation7 + $0x182]]  ;;  %v481_v32 = vmul.f32 %v480_v25, %v1402_v10  ;;  %v484_v35 = vstv %s1405_s14 }
  0x87   : > { %s1418_s18 = sld [smem:[#allocation7 + $0x202]]  ;;  %v478_v31 = vadd.f32 %v477_v24, %v474_v23  ;;  %v485_v45 = vmul.f32 %v484_v35, %v1410_v16  ;;  %v488_v46 = vstv %s1408_s15  ;;  %v468_v54 = vadd.f32 %v467_v41, %v464_v40 }
  0x88   : > { %v492_v30 = vstv %s835_s17  ;;  %s841_s29 = sld [smem:[#allocation7 + $0x3]]  ;;  %v489_v55 = vmul.f32 %v488_v46, %v1420_v27 }
  0x89   : > { %v493_v33 = vmul.f32 %v492_v30, %v1383_v56  ;;  %v495_v34 = vstv %s836_s16  ;;  %s1425_s22 = sld [smem:[#allocation9 + $0x3]]  ;;  %v482_v44 = vadd.f32 %v481_v32, %v478_v31  ;;  %v1454_v15 = vmax.f32 %v468_v54, 0.0 }
  0x8a   : > { %v498_v36 = vstv %s837_s21  ;;  %s843_s23 = sld [smem:[#allocation7 + $0x83]] }
  0x8b   : > { %v496_v37 = vadd.f32 %v495_v34, %v493_v33  ;;  %v499_v38 = vmul.f32 %v498_v36, %v1392_v63  ;;  %v502_v39 = vstv %s838_s13  ;;  %s844_s9 = sld [smem:[#allocation7 + $0x103]]  ;;  %v486_v58 = vadd.f32 %v485_v45, %v482_v44 }
  0x8c   : > { %v503_v42 = vmul.f32 %v502_v39, %v1402_v10  ;;  %v506_v43 = vstv %s839_s20  ;;  %s845_s8 = sld [smem:[#allocation7 + $0x183]] }
  0x8d   : > { %v500_v47 = vadd.f32 %v499_v38, %v496_v37  ;;  %s1433_s19 = sld [smem:[#allocation7 + $0x203]]  ;;  %v507_v48 = vmul.f32 %v506_v43, %v1410_v16  ;;  %v510_v51 = vstv %s1418_s18  ;;  %v490_v7 = vadd.f32 %v489_v55, %v486_v58 }
  0x8e   : > { %v514_v49 = vstv %s841_s29  ;;  %s847_s14 = sld [smem:[#allocation7 + $0x4]]  ;;  %v511_v0 = vmul.f32 %v510_v51, %v1420_v27 }
  0x8f   : > { %v504_v50 = vadd.f32 %v503_v42, %v500_v47  ;;  %v515_v52 = vmul.f32 %v514_v49, %v1383_v56  ;;  %v517_v53 = vstv %s1425_s22  ;;  %s1439_s17 = sld [smem:[#allocation9 + $0x4]]  ;;  %v558_v25 = vmax.f32 %v490_v7, 0.0 }
  0x90   : > { %v520_v57 = vstv %s843_s23  ;;  %s849_s15 = sld [smem:[#allocation7 + $0x84]] }
  0x91   : > { %v518_v59 = vadd.f32 %v517_v53, %v515_v52  ;;  %v521_v60 = vmul.f32 %v520_v57, %v1392_v63  ;;  %v524_v61 = vstv %s844_s9  ;;  %s850_s16 = sld [smem:[#allocation7 + $0x104]]  ;;  %v508_v62 = vadd.f32 %v507_v48, %v504_v50 }
  0x92   : > { %v525_v1 = vmul.f32 %v524_v61, %v1402_v10  ;;  %v528_v2 = vstv %s845_s8  ;;  %s851_s21 = sld [smem:[#allocation7 + $0x184]] }
  0x93   : > { %v522_v4 = vadd.f32 %v521_v60, %v518_v59  ;;  %v529_v3 = vmul.f32 %v528_v2, %v1410_v16  ;;  %v532_v5 = vstv %s1433_s19  ;;  %s1447_s13 = sld [smem:[#allocation7 + $0x204]]  ;;  %v512_v12 = vadd.f32 %v511_v0, %v508_v62 }
  0x94   : > { %v536_v6 = vstv %s847_s14  ;;  %s562_s20 = sld [smem:[#allocation10]]  ;;  %v533_v13 = vmul.f32 %v532_v5, %v1420_v27 }
  0x95   : > { %v526_v8 = vadd.f32 %v525_v1, %v522_v4  ;;  %v537_v9 = vmul.f32 %v536_v6, %v1383_v56  ;;  %v539_v11 = vstv %s1439_s17  ;;  %s1451_s18 = sld [smem:[#allocation12]]  ;;  %v559_v28 = vmax.f32 %v512_v12, 0.0 }
  0x96   : > { %v542_v14 = vstv %s849_s15  ;;  %s853_s29 = sld [smem:[#allocation10 + $0x80]] }
  0x97   : > { %v530_v17 = vadd.f32 %v529_v3, %v526_v8  ;;  %v540_v18 = vadd.f32 %v539_v11, %v537_v9  ;;  %v543_v19 = vmul.f32 %v542_v14, %v1392_v63  ;;  %v546_v20 = vstv %s850_s16  ;;  %s854_s22 = sld [smem:[#allocation10 + $0x100]] }
  0x98   : > { %v547_v56 = vmul.f32 %v546_v20, %v1402_v10  ;;  %v550_v21 = vstv %s851_s21  ;;  %s1458_s23 = sld [smem:[#allocation10 + $0x180]] }
  0x99   : > { %v544_v22 = vadd.f32 %v543_v19, %v540_v18  ;;  %v551_v23 = vmul.f32 %v550_v21, %v1410_v16  ;;  %v554_v24 = vstv %s1447_s13  ;;  %s1462_s9 = sld [smem:[#allocation10 + $0x200]]  ;;  %v534_v26 = vadd.f32 %v533_v13, %v530_v17 }
  0x9a   : > { %v563_v29 = vstv %s562_s20  ;;  %s857_s8 = sld [smem:[#allocation10 + $0x1]]  ;;  %v555_v30 = vmul.f32 %v554_v24, %v1420_v27 }
  0x9b   : > { %v548_v63 = vadd.f32 %v547_v56, %v544_v22  ;;  %v564_v10 = vmul.f32 %v563_v29, %v1454_v15  ;;  %v566_v31 = vstv %s1451_s18  ;;  %s858_s19 = sld [smem:[#allocation12 + $0x1]]  ;;  %v560_v36 = vmax.f32 %v534_v26, 0.0 }
  0x9c   : > { %v569_v32 = vstv %s853_s29  ;;  %s859_s14 = sld [smem:[#allocation10 + $0x81]] }
  0x9d   : > { %v552_v33 = vadd.f32 %v551_v23, %v548_v63  ;;  %v567_v16 = vadd.f32 %v566_v31, %v564_v10  ;;  %v570_v34 = vmul.f32 %v569_v32, %v558_v25  ;;  %v573_v35 = vstv %s854_s22  ;;  %s860_s17 = sld [smem:[#allocation10 + $0x101]] }
  0x9e   : > { %v574_v37 = vmul.f32 %v573_v35, %v559_v28  ;;  %s861_s15 = sld [smem:[#allocation10 + $0x181]]  ;;  %v577_v40 = vstv %s1458_s23  ;;  %s341_s23 = sand.u32 1, %s1135_s25  }
  0x9f   : > { %v556_v38 = vadd.f32 %v555_v30, %v552_v33  ;;  %v571_v39 = vadd.f32 %v570_v34, %v567_v16  ;;  %s862_s16 = sld [smem:[#allocation10 + $0x201]]  ;;  %v578_v45 = vmul.f32 %v577_v40, %v560_v36  ;;  %v581_v47 = vstv %s1462_s9  ;;  %s800_s9 = sshll.u32 %s341_s23, 2 }
  0xa0   : > { %v585_v27 = vstv %s857_s8  ;;  %s863_s21 = sld [smem:[#allocation10 + $0x2]]  ;;  %s870_s8 = sshll.u32 %s1213_s28, 6 }
  0xa1   : > { %v586_v41 = vmul.f32 %v585_v27, %v1454_v15  ;;  %v588_v42 = vstv %s858_s19  ;;  %s864_s13 = sld [smem:[#allocation12 + $0x2]]  ;;  %v561_v43 = vmax.f32 %v556_v38, 0.0  ;;  %v575_v44 = vadd.f32 %v574_v37, %v571_v39  ;;  %s343_s19 = scalar_lea.vmem [#allocation14], %s800_s9 }
  0xa2   : > { %v591_v46 = vstv %s859_s14  ;;  %s865_s20 = sld [smem:[#allocation10 + $0x82]]  ;;  %s662_s14 = sshll.u32 %s343_s19, 4  ;;  %s1478_s14 = int_to_ptr.vmem [resolvable:$true] %s662_s14 }
  0xa3   : > { %v589_v48 = vadd.f32 %v588_v42, %v586_v41  ;;  %v592_v49 = vmul.f32 %v591_v46, %v558_v25  ;;  %s866_s18 = sld [smem:[#allocation10 + $0x102]]  ;;  %v595_v50 = vstv %s860_s17  ;;  %v579_v55 = vadd.f32 %v578_v45, %v575_v44  ;;  %s649_s28 = scalar_lea.sflag [#allocation3], %s341_s23 }
  0xa4   : > { %v599_v51 = vstv %s861_s15  ;;  %s867_s29 = sld [smem:[#allocation10 + $0x182]]  ;;  %v596_v53 = vmul.f32 %v595_v50, %v559_v28  ;;  %v582_v57 = vmul.f32 %v581_v47, %v561_v43 }
  0xa5   : > { %v593_v52 = vadd.f32 %v592_v49, %v589_v48  ;;  %v600_v54 = vmul.f32 %v599_v51, %v560_v36  ;;  %s868_s22 = sld [smem:[#allocation10 + $0x202]]  ;;  %v603_v58 = vstv %s862_s16  ;;  %s1476_s16 = scalar_lea.hbm %s1524_s7, %s870_s8 }
  0xa6   : > { %v607_v59 = vstv %s863_s21  ;;  %v604_v61 = vmul.f32 %v603_v58, %v561_v43  ;;  %v583_v6 = vadd.f32 %v582_v57, %v579_v55  ;;  %s1063_s21 = scalar_lea.vmem %s1478_s14, 64 }
  0xa7   : > { %v597_v60 = vadd.f32 %v596_v53, %v593_v52  ;;  %v608_v62 = vmul.f32 %v607_v59, %v1454_v15  ;;  %v610_v0 = vstv %s864_s13  ;;  %p1064_p8 = scmp.ne.s32.totalorder %s1478_s14, %s1063_s21  ;;  %s1151_s13 = smov [#allocation14]  }
  0xa8   : > { %v613_v1 = vstv %s865_s20  ;;  %s1067_s20 = sshll.u32 %s1151_s13, 4  ;;  %s1068_s20 = int_to_ptr.vmem [resolvable:$false] %s1067_s20 }
  0xa9   : > { %v601_v2 = vadd.f32 %v600_v54, %v597_v60  ;;  %v611_v4 = vadd.f32 %v610_v0, %v608_v62  ;;  %v614_v3 = vmul.f32 %v613_v1, %v558_v25  ;;  %v617_v5 = vstv %s866_s18  ;;  %p1065_p11 = pnand %p1064_p8, %p1230_p5  ;;  %s1069_s18 = scalar_lea.vmem %s1068_s20, 128 }
  0xaa   : > { %v618_v7 = vmul.f32 %v617_v5, %v559_v28  ;;  %v621_v8 = vstv %s867_s29  ;;  %p1070_p13 = scmp.lt.s32.totalorder %s1478_s14, %s1068_s20  ;;  %p1071_p2 = scmp.lt.s32.totalorder %s1069_s18, %s1063_s21 }
  0xab   : > { %v605_v9 = vadd.f32 %v604_v61, %v601_v2  ;;  %v615_v11 = vadd.f32 %v614_v3, %v611_v4  ;;  %v622_v12 = vmul.f32 %v621_v8, %v560_v36  ;;  %v625_v13 = vstv %s868_s22  ;;  %p1066_p0 = pneg %p1065_p11 }
  0xac   : > { %v626_v17 = vmul.f32 %v625_v13, %v561_v43  ;;  %p1072_p1 = por %p1071_p2, %p1070_p13 }
  0xad   : > { %v619_v14 = vadd.f32 %v618_v7, %v615_v11  ;;  %v628_v19 = vmax.f32 %v583_v6, %v605_v9 }
  0xae   : > { %p1073_p3 = pnand %p1072_p1, %p1066_p0 }
  0xaf   : > { %v623_v18 = vadd.f32 %v622_v12, %v619_v14 }
  0xb1   : > { %v627_v20 = vadd.f32 %v626_v17, %v623_v18 }
  0xb3   : > { %v629_v56 = vmax.f32 %v628_v19, %v627_v20 }
  0xb5   : > { %v630_v15 = vsub.f32 %v583_v6, %v629_v56  ;;  %v633_v21 = vsub.f32 %v605_v9, %v629_v56  ;;  %v636_v22 = vsub.f32 %v627_v20, %v629_v56 }
  0xb7   : > { %v631_v23 = vmul.f32 1.442695, %v630_v15  ;;  %v634_v24 = vmul.f32 1.442695, %v633_v21  ;;  %v637_v25 = vmul.f32 1.442695, %v636_v22 }
  0xb9   : > { %973 = vpow2.f32 %v631_v23 }
  0xba   : > { %975 = vpow2.f32 %v634_v24 }
  0xbb   : > { %977 = vpow2.f32 %v637_v25 }
  0xc6   : > { %v974_v26 = vpop.eup %973 }
  0xc7   : > { %v976_v28 = vpop.eup %975 }
  0xc8   : > { %v978_v29 = vpop.eup %977  ;;  %v639_v63 = vadd.f32 %v976_v28, %v974_v26 }
  0xca   : > { %v640_v30 = vadd.f32 %v978_v29, %v639_v63 }
  0xcc   : > { %979 = vrcp.f32 %v640_v30 }
  0xd9   : > { %v980_v10 = vpop.eup %979 }
  0xda   : > { %v642_v31 = vmul.f32 %v980_v10, %v974_v26  ;;  %v644_v32 = vmul.f32 %v980_v10, %v976_v28  ;;  %v646_v33 = vmul.f32 %v980_v10, %v978_v29 }
  0xdc   : > { %643 = vst [vmem:[%s343_s19] sm:$0x1] %v642_v31  ;;  %645 = vst [vmem:[%s343_s19 + $0x1] sm:$0x1] %v644_v32 }
  0xdd   : > { %647 = vst [vmem:[%s343_s19 + $0x2] sm:$0x1] %v646_v33 }
  0xde   : > { %1076 = shalt.err (!%p1073_p3)
}
  0xdf   : > { %s1077_s29 = scalar_lea.hbm %s1476_s16, 64  ;;  %s1081_s9 = scalar_lea.hbm %s1524_s7, 192 }
  0xe0   : > { %p1078_p12 = scmp.ne.s32.totalorder %s1476_s16, %s1077_s29  ;;  %p1082_p4 = scmp.lt.s32.totalorder %s1476_s16, %s1524_s7 }
  0xe1   : > { %p1083_p6 = scmp.lt.s32.totalorder %s1081_s9, %s1077_s29 }
  0xe2   : > { %p1079_p10 = pnand %p1078_p12, %p1230_p5 }
  0xe3   : > { %p1084_p7 = por %p1083_p6, %p1082_p4 }
  0xe4   : > { %p1080_p9 = pneg %p1079_p10 }
  0xe6   : > { %p1085_p8 = pnand %p1084_p7, %p1080_p9 }
  0xe8   : > { %1088 = shalt.err (!%p1085_p8)
}
  0xe9   : > { %897 = dma.vmem_to_hbm [thread:$0]  (%p1230_p5), %s1478_s14, 64, %s1476_s16, %s649_s28  }
  0xea PF: > { %p934_p11 = scmp.ge.s32.totalorder %s1143_s27, 2  ;;  %s674_s17 = sand.u32 1, %s1131_s24  }
  0xeb   : > { %p1540_p0 = scmp.ne.s32.totalorder %s1527_s12, 0  ;;  %s675_s15 = scalar_lea.sflag [#allocation3], %s674_s17 }
  0xed   : > { %p919_p13 = pnand %p934_p11, %p1540_p0 }
  0xef   : > { %p920_p2 = pneg %p919_p13 }
  0xf1   : > { %1126 = dma.done.wait (%p920_p2), %s675_s15, 64  }
  0xf2   : > { %1128 = vsyncadd (%p920_p2), %s675_s15, 4294967232  ;;  %p22_p1 = scmp.ge.s32.totalorder %s1217_s30, 5   ;;  %s1541_s24 = smov %s1135_s25 }
  0xf3   : > { %s1542_s25 = smov %s1139_s26  ;;  %s1543_s26 = smov %s1228_s10 }
  0xf4   : > { %s1544_s27 = smov %s1217_s30  ;;  %24 = sbr.rel (!%p22_p1) target bundleno = 8 (0x8), region = 109 }
  0xf9   :  { %680 = vsyncpa [#allocation3], 1 }
  0xfa   :  { %682 = vsyncpa [#allocation3 + $0x1], 1 }
  0xfb   :  { %683 = vsyncpa [#allocation4], 1 }
  0xfc   :  { %685 = vsyncpa [#allocation4 + $0x1], 1 }
  0xfd   :  { %686 = vsyncpa [#allocation13], 1 }
  0xfe   :  { %687 = vsyncpa [#allocation5], 1 }
  0xff   :  { %689 = vsyncpa [#allocation5 + $0x1], 1 }
 0x100   :  { %690 = vsyncpa [#allocation8], 1 }
 0x101   :  { %691 = vsyncpa [#allocation11], 1 }

</bundles_post_ra>
